<compile_context>
chip_gen: v7x
topology: tpu7x:2x2x1
jax: 0.10.0
libtpu: 0.0.40
codegen_flags: <defaults>
</compile_context>

<pallas_src>
import functools
import math

import jax
import jax.numpy as jnp
from jax import lax
from jax.experimental import pallas as pl
from jax.experimental.pallas import tpu as pltpu

_LANES = 128         # vreg lane width
_BLOCK_ROWS = 4096   # rows per grid step (2 MiB f32 / input / buffer)


def _default_num_splits():
    # 2-way grid split only helps on chips with >1 TensorCore (v7x); on
    # single-TC v5e/v6e it just adds mask work and a wasted duplicate step.
    # TODO(synk): verify "parallel" actually engages megacore partitioning on
    # v7x; switch that axis to pltpu.CORE_PARALLEL if it runs sequentially.
    try:
        kind = jax.devices()[0].device_kind.lower()
    except Exception:
        return 1
    return 2 if ("v7" in kind or "7x" in kind) else 1


def _charbonnier_kernel(pred_ref, gt_ref, out_ref, acc_ref, *,
                        eps, tm, spc, acc_rows, need_mask, n_rows_valid):
    i = pl.program_id(1)

    # init per-split vector accumulator on first inner step
    @pl.when(i == 0)
    def _():
        acc_ref[...] = jnp.zeros_like(acc_ref)

    # cast inside the kernel: HBM traffic stays at the input dtype width
    d = pred_ref[...].astype(jnp.float32) - gt_ref[...].astype(jnp.float32)
    val = jnp.sqrt(d * d + eps)

    def _accumulate(v):
        if acc_rows == tm:
            acc_ref[...] += v
        else:
            # fold (tm,128) into the small (8,128) accumulator; the reshape
            # keeps (8,128) tiles intact so this lowers to pure vreg adds.
            acc_ref[...] += v.reshape(tm // acc_rows, acc_rows, _LANES).sum(axis=0)

    if need_mask:
        c = pl.program_id(0)
        rb = c * spc + i                       # logical (unclamped) block index

        # interior blocks: plain unmasked accumulate (keeps v7x HBM-bound)
        @pl.when((rb + 1) * tm <= n_rows_valid)
        def _():
            _accumulate(val)

        # tail block (partial rows) and clamped-duplicate blocks: masked add
        @pl.when((rb + 1) * tm > n_rows_valid)
        def _():
            row_g = rb * tm + lax.broadcasted_iota(jnp.int32, val.shape, 0)
            _accumulate(jnp.where(row_g < n_rows_valid, val, 0.0))
    else:
        _accumulate(val)

    # finalize: single cross-lane reduce of the (acc_rows,128) slab per split
    @pl.when(i == pl.num_programs(1) - 1)
    def _():
        out_ref[...] = jnp.sum(acc_ref[...]).reshape(1, 1, 1)


def charbonnier_loss(pred, gt, eps=1e-08, *, block_rows=_BLOCK_ROWS,
                     num_splits=None):
    assert pred.shape == gt.shape
    n = int(math.prod(pred.shape))
    assert n > 0

    flat_p = jnp.ravel(pred)
    flat_g = jnp.ravel(gt)

    n_rem = n % _LANES
    n_main = n - n_rem

    # Ragged <128-element tail: negligible plain-jnp work in the wrapper.
    # (Avoids jnp.pad, which would materialize full padded copies of BOTH
    # inputs in HBM and double traffic for this bandwidth-bound kernel.)
    tail_sum = jnp.zeros((), jnp.float32)
    if n_rem:
        tp = flat_p[n_main:].astype(jnp.float32)
        tg = flat_g[n_main:].astype(jnp.float32)
        td = tp - tg
        tail_sum = jnp.sum(jnp.sqrt(td * td + float(eps)))

    if n_main == 0:
        return tail_sum / n

    m_rows = n_main // _LANES
    # On the 128-aligned fast path these are free bitcasts.
    # TODO(synk): when n_rem != 0 the prefix slice may still materialize one
    # copy of the main slab; still strictly better than padding both inputs.
    p2d = flat_p[:n_main].reshape(m_rows, _LANES)
    g2d = flat_g[:n_main].reshape(m_rows, _LANES)

    tm = min(block_rows, m_rows)
    nb = pl.cdiv(m_rows, tm)

    if num_splits is None:
        num_splits = _default_num_splits()
    num_splits = max(1, min(num_splits, nb))
    spc = pl.cdiv(nb, num_splits)             # row blocks per split

    need_mask = (m_rows % tm != 0) or (nb % num_splits != 0)
    acc_rows = 8 if tm % 8 == 0 else tm       # small (8,128) acc when possible

    def row_block_map(c, i):
        # clamp so the duplicated tail block of the last split stays in range;
        # its contribution is masked to zero inside the kernel.
        return (jnp.minimum(c * spc + i, nb - 1), 0)

    kernel = functools.partial(
        _charbonnier_kernel, eps=float(eps), tm=tm, spc=spc,
        acc_rows=acc_rows, need_mask=need_mask, n_rows_valid=m_rows)

    itemsize = jnp.dtype(pred.dtype).itemsize
    vmem_limit = int(2 * 2 * tm * _LANES * itemsize   # 2 double-buffered inputs
                     + acc_rows * _LANES * 4          # accumulator scratch
                     + (4 << 20))                     # headroom

    cost = pl.CostEstimate(flops=3 * n, transcendentals=n,
                           bytes_accessed=2 * n * itemsize)

    partials = pl.pallas_call(
        kernel,
        out_shape=jax.ShapeDtypeStruct((num_splits, 1, 1), jnp.float32),
        grid_spec=pltpu.PrefetchScalarGridSpec(
            num_scalar_prefetch=0,
            grid=(num_splits, spc),
            in_specs=[
                pl.BlockSpec((tm, _LANES), row_block_map),
                pl.BlockSpec((tm, _LANES), row_block_map),
            ],
            out_specs=pl.BlockSpec((1, 1, 1), lambda c, i: (c, 0, 0)),
            scratch_shapes=[pltpu.VMEM((acc_rows, _LANES), jnp.float32)],
        ),
        compiler_params=pltpu.CompilerParams(
            dimension_semantics=("parallel", "arbitrary"),
            vmem_limit_bytes=vmem_limit,
        ),
        cost_estimate=cost,
    )(p2d, g2d)

    return (jnp.sum(partials) + tail_sum) / n


if __name__ == "__main__":
    key = jax.random.PRNGKey(0)
    k1, k2 = jax.random.split(key)
    # NCHW like the PyTorch module would see
    pred = jax.random.normal(k1, (2, 4, 16, 16), dtype=jnp.float32)
    gt = jax.random.normal(k2, (2, 4, 16, 16), dtype=jnp.float32)

    loss = charbonnier_loss(pred, gt, eps=1e-08)
    jax.block_until_ready(loss)

    # reference check in plain JAX
    diff = pred - gt
    ref = jnp.mean(jnp.sqrt(diff * diff + 1e-08))
    assert jnp.allclose(loss, ref, rtol=1e-5, atol=1e-6), (loss, ref)

    # also exercise a ragged (non-multiple-of-128) path
    pred_r = jax.random.normal(k1, (3, 5, 7), dtype=jnp.float32)
    gt_r = jax.random.normal(k2, (3, 5, 7), dtype=jnp.float32)
    loss_r = charbonnier_loss(pred_r, gt_r, eps=1e-08)
    jax.block_until_ready(loss_r)
    dr = pred_r - gt_r
    ref_r = jnp.mean(jnp.sqrt(dr * dr + 1e-08))
    assert jnp.allclose(loss_r, ref_r, rtol=1e-5, atol=1e-6), (loss_r, ref_r)

    print("KERNEL_OK")
</pallas_src>

<mosaic_0001>
module attributes {stable_mosaic.version = 11 : i64} {
  func.func @_charbonnier_kernel(%arg0: i32, %arg1: i32, %arg2: memref<16x128xf32, #tpu.memory_space<vmem>>, %arg3: memref<16x128xf32, #tpu.memory_space<vmem>>, %arg4: memref<1x1x1xf32, #tpu.memory_space<vmem>>, %arg5: memref<8x128xf32, #tpu.memory_space<vmem>>) attributes {dimension_semantics = [#tpu.dimension_semantics<parallel>, #tpu.dimension_semantics<arbitrary>], iteration_bounds = array<i64: 1, 1>, scalar_prefetch = 0 : i64, scratch_operands = 1 : i64, tpu.core_type = #tpu.core_type<tc>, window_params = [{transform_indices = @transform_0, window_bounds = array<i64: 16, 128>}, {transform_indices = @transform_1, window_bounds = array<i64: 16, 128>}, {transform_indices = @transform_2, window_bounds = array<i64: 1, 1, 1>}]} {
    %c0_i32 = arith.constant 0 : i32
    %0 = arith.cmpi eq, %arg1, %c0_i32 : i32
    %1 = arith.extui %0 : i1 to i32
    %c0_i32_0 = arith.constant 0 : i32
    %2 = arith.cmpi ne, %1, %c0_i32_0 : i32
    scf.if %2 {
      %cst_11 = arith.constant 0.000000e+00 : f32
      %18 = vector.broadcast %cst_11 : f32 to vector<8x128xf32>
      %c0_12 = arith.constant 0 : index
      %c0_13 = arith.constant 0 : index
      %19 = vector.load %arg5[%c0_12, %c0_13] : memref<8x128xf32, #tpu.memory_space<vmem>>, vector<8x128xf32>
      tpu.vector_store %arg5[%c0_12, %c0_13], %18 {strides = array<i32>} : memref<8x128xf32, #tpu.memory_space<vmem>>, vector<8x128xf32>,
    } else {
    }
    %c0 = arith.constant 0 : index
    %c0_1 = arith.constant 0 : index
    %3 = vector.load %arg2[%c0, %c0_1] : memref<16x128xf32, #tpu.memory_space<vmem>>, vector<16x128xf32>
    %c0_2 = arith.constant 0 : index
    %c0_3 = arith.constant 0 : index
    %4 = vector.load %arg3[%c0_2, %c0_3] : memref<16x128xf32, #tpu.memory_space<vmem>>, vector<16x128xf32>
    %5 = arith.subf %3, %4 : vector<16x128xf32>
    %6 = arith.mulf %5, %5 : vector<16x128xf32>
    %cst = arith.constant 9.99999993E-9 : f32
    %7 = vector.broadcast %cst : f32 to vector<16x128xf32>
    %8 = arith.addf %6, %7 : vector<16x128xf32>
    %9 = math.sqrt %8 : vector<16x128xf32>
    %c0_4 = arith.constant 0 : index
    %c0_5 = arith.constant 0 : index
    %10 = vector.load %arg5[%c0_4, %c0_5] : memref<8x128xf32, #tpu.memory_space<vmem>>, vector<8x128xf32>
    %11 = vector.shape_cast %9 : vector<16x128xf32> to vector<2x8x128xf32>
    %cst_6 = arith.constant dense<0.000000e+00> : vector<8x128xf32>
    %12 = vector.multi_reduction <add>, %11, %cst_6 [0] : vector<2x8x128xf32> to vector<8x128xf32>
    %13 = arith.addf %10, %12 : vector<8x128xf32>
    %c0_7 = arith.constant 0 : index
    %c0_8 = arith.constant 0 : index
    %14 = vector.load %arg5[%c0_7, %c0_8] : memref<8x128xf32, #tpu.memory_space<vmem>>, vector<8x128xf32>
    tpu.vector_store %arg5[%c0_7, %c0_8], %13 {strides = array<i32>} : memref<8x128xf32, #tpu.memory_space<vmem>>, vector<8x128xf32>,
    %c0_i32_9 = arith.constant 0 : i32
    %15 = arith.cmpi eq, %arg1, %c0_i32_9 : i32
    %16 = arith.extui %15 : i1 to i32
    %c0_i32_10 = arith.constant 0 : i32
    %17 = arith.cmpi ne, %16, %c0_i32_10 : i32
    scf.if %17 {
      %c0_11 = arith.constant 0 : index
      %c0_12 = arith.constant 0 : index
      %18 = vector.load %arg5[%c0_11, %c0_12] : memref<8x128xf32, #tpu.memory_space<vmem>>, vector<8x128xf32>
      %19 = vector.shape_cast %18 : vector<8x128xf32> to vector<1x8x128xf32>
      %cst_13 = arith.constant dense<0.000000e+00> : vector<1xf32>
      %20 = vector.multi_reduction <add>, %19, %cst_13 [1, 2] : vector<1x8x128xf32> to vector<1xf32>
      %21 = vector.shape_cast %20 : vector<1xf32> to vector<1x1x1xf32>
      %22 = vector.extract %21[0, 0, 0] : f32 from vector<1x1x1xf32>
      %23 = vector.broadcast %22 : f32 to vector<1x1x1xf32>
      %c0_14 = arith.constant 0 : index
      %c0_15 = arith.constant 0 : index
      %c0_16 = arith.constant 0 : index
      %24 = vector.load %arg4[%c0_14, %c0_15, %c0_16] : memref<1x1x1xf32, #tpu.memory_space<vmem>>, vector<1x1x1xf32>
      tpu.vector_store %arg4[%c0_14, %c0_15, %c0_16], %23 {strides = array<i32>} : memref<1x1x1xf32, #tpu.memory_space<vmem>>, vector<1x1x1xf32>,
    } else {
    }
    return
  }
  func.func @transform_0(%arg0: i32, %arg1: i32) -> (i32, i32) {
    %c1_i32 = arith.constant 1 : i32
    %0 = arith.muli %arg0, %c1_i32 : i32
    %1 = arith.addi %0, %arg1 : i32
    %c0_i32 = arith.constant 0 : i32
    %2 = arith.minsi %1, %c0_i32 : i32
    %c0_i32_0 = arith.constant 0 : i32
    %c0_i32_1 = arith.constant 0 : i32
    return %2, %c0_i32_0 : i32, i32
  }
  func.func @transform_1(%arg0: i32, %arg1: i32) -> (i32, i32) {
    %c1_i32 = arith.constant 1 : i32
    %0 = arith.muli %arg0, %c1_i32 : i32
    %1 = arith.addi %0, %arg1 : i32
    %c0_i32 = arith.constant 0 : i32
    %2 = arith.minsi %1, %c0_i32 : i32
    %c0_i32_0 = arith.constant 0 : i32
    %c0_i32_1 = arith.constant 0 : i32
    return %2, %c0_i32_0 : i32, i32
  }
  func.func @transform_2(%arg0: i32, %arg1: i32) -> (i32, i32, i32) {
    %c0_i32 = arith.constant 0 : i32
    %c0_i32_0 = arith.constant 0 : i32
    %c0_i32_1 = arith.constant 0 : i32
    return %arg0, %c0_i32, %c0_i32_0 : i32, i32, i32
  }
}

</mosaic_0001>

<bundles_post_ra>
// kernel: tpu_custom_call.1
= control target key start
LH: loop header
LB: loop body
LE: loop exit
PB: predicated region body
PF: predicated region fallthrough
CT: control target
= control target key end

     0   :  { %7 = vsyncpa [#allocation4], 0  ;;  %s268_s0 = inlined_call_operand.hbm [shape: f32[16,128], index: 0, kind: input, shape index: {}]   ;;  %s269_s1 = inlined_call_operand.hbm [shape: f32[16,128], index: 1, kind: input, shape index: {}]   ;;  %s270_s2 = inlined_call_operand.hbm [shape: f32[1,1,1], index: 2, kind: output, shape index: {}]  }
   0x1   :  { %8 = vsyncpa [#allocation7], 0 }
   0x2   :  { %9 = vsyncpa [#allocation5], 0  ;;  %s212_s9 = smov [#allocation3]   ;;  %s140_s13 = scalar_lea.hbm %s268_s0, 256 }
   0x3   :  { %s21_s10 = sshll.u32 %s212_s9, 4  ;;  %p141_p0 = scmp.ne.s32.totalorder %s268_s0, %s140_s13  ;;  %s22_s10 = int_to_ptr.vmem [resolvable:$true] %s21_s10 }
   0x4   :  { %p144_p1 = scmp.lt.u32.totalorder %s140_s13, %s268_s0 }
   0x6   :  { %p146_p2 = pnand %p144_p1, %p141_p0 }
   0x8   :  { %149 = shalt.err (!%p146_p2)
}
   0x9   :  { %s150_s18 = scalar_lea.vmem %s22_s10, 256  ;;  %p155_p4 = scmp.lt.s32.totalorder %s22_s10, %s22_s10 }
   0xa   :  { %p151_p3 = scmp.ne.s32.totalorder %s22_s10, %s150_s18  ;;  %p156_p5 = scmp.lt.s32.totalorder %s150_s18, %s150_s18 }
   0xc   :  { %p157_p6 = por %p156_p5, %p155_p4 }
   0xe   :  { %p158_p7 = pnand %p157_p6, %p151_p3 }
  0x10   :  { %161 = shalt.err (!%p158_p7)
}
  0x11   :  { %s213_s19 = smov 128   ;;  %s214_s20 = smov 8  }
  0x12   :  { %27 = dma.hbm_to_vmem [thread:$0]  %s268_s0, 256, %s22_s10, [#allocation4], %s213_s19, %s213_s19, %s214_s20  }
  0x13   :  { %s215_s23 = smov [#allocation6]   ;;  %s162_s27 = scalar_lea.hbm %s269_s1, 256 }
  0x14   :  { %s39_s24 = sshll.u32 %s215_s23, 4  ;;  %p163_p8 = scmp.ne.s32.totalorder %s269_s1, %s162_s27  ;;  %s40_s24 = int_to_ptr.vmem [resolvable:$true] %s39_s24 }
  0x15   :  { %p166_p9 = scmp.lt.u32.totalorder %s162_s27, %s269_s1 }
  0x17   :  { %p168_p10 = pnand %p166_p9, %p163_p8 }
  0x19   :  { %171 = shalt.err (!%p168_p10)
}
  0x1a   :  { %s172_s4 = scalar_lea.vmem %s40_s24, 256  ;;  %p177_p12 = scmp.lt.s32.totalorder %s40_s24, %s40_s24 }
  0x1b   :  { %p173_p11 = scmp.ne.s32.totalorder %s40_s24, %s172_s4  ;;  %p178_p13 = scmp.lt.s32.totalorder %s172_s4, %s172_s4 }
  0x1d   :  { %p179_p0 = por %p178_p13, %p177_p12 }
  0x1f   :  { %p180_p1 = pnand %p179_p0, %p173_p11 }
  0x21   :  { %183 = shalt.err (!%p180_p1)
}
  0x22   :  { %45 = dma.hbm_to_vmem [thread:$0]  %s269_s1, 256, %s40_s24, [#allocation7], %s213_s19, %s213_s19, %s214_s20  }
  0x23   :  { %206 = dma.done.wait [#allocation4], 256  }
  0x24   :  { %207 = vsyncadd [#allocation4], 4294967040 }
  0x25   :  { %208 = dma.done.wait [#allocation7], 256  }
  0x26   :  { %209 = vsyncadd [#allocation7], 4294967040  ;;  %v65_v0 = vld [vmem:[#allocation3] sm:$0xff]  ;;  %v66_v1 = vld [vmem:[#allocation3 + $0x8] sm:$0xff]  ;;  %s216_s1 = smov [#allocation8]   ;;  %vm107_vm4 = vcmask 0  }
  0x27   :  { %v67_v2 = vld [vmem:[#allocation6] sm:$0xff]  ;;  %v68_v3 = vld [vmem:[#allocation6 + $0x8] sm:$0xff]  ;;  %s115_s6 = sshll.u32 %s216_s1, 4  ;;  %s116_s6 = int_to_ptr.vmem [resolvable:$true] %s115_s6 }
  0x28   :  { %v69_v4 = vsub.f32 %v65_v0, %v67_v2  ;;  %v70_v5 = vsub.f32 %v66_v1, %v68_v3  ;;  %s184_s8 = scalar_lea.vmem %s116_s6, 16  ;;  %s188_s9 = scalar_lea.vmem %s116_s6, 32 }
  0x29   :  { %p185_p2 = scmp.ne.s32.totalorder %s116_s6, %s184_s8  ;;  %p189_p3 = scmp.lt.s32.totalorder %s116_s6, %s116_s6 }
  0x2a   :  { %v71_v6 = vmul.f32 %v69_v4, %v69_v4  ;;  %v72_v7 = vmul.f32 %v70_v5, %v70_v5  ;;  %p190_p4 = scmp.lt.s32.totalorder %s188_s9, %s184_s8 }
  0x2c   :  { %v73_v8 = vadd.f32 1e-08, %v71_v6  ;;  %v74_v9 = vadd.f32 1e-08, %v72_v7  ;;  %p191_p5 = por %p190_p4, %p189_p3 }
  0x2e   :  { %136 = vrsqrt.f32 %v73_v8  ;;  %vm77_vm0 = vcmp.eq.f32.partialorder %v73_v8, inf  ;;  %v80_v11 = vand.u32 2147483648, %v73_v8  ;;  %vm79_vm1 = vcmp.eq.f32.partialorder %v73_v8, 0.0  ;;  %p192_p6 = pnand %p191_p5, %p185_p2 }
  0x2f   :  { %138 = vrsqrt.f32 %v74_v9  ;;  %vm84_vm2 = vcmp.eq.f32.partialorder %v74_v9, inf  ;;  %v87_v14 = vand.u32 2147483648, %v74_v9  ;;  %vm86_vm3 = vcmp.eq.f32.partialorder %v74_v9, 0.0 }
  0x38   :  { %v137_v10 = vpop.eup %136 }
  0x39   :  { %v139_v12 = vpop.eup %138  ;;  %v76_v13 = vmul.f32 %v137_v10, %v73_v8 }
  0x3a   :  { %v83_v15 = vmul.f32 %v139_v12, %v74_v9 }
  0x3b   :  { %v78_v16 = vsel %vm77_vm0, %v73_v8, %v76_v13 }
  0x3c   :  { %v81_v17 = vsel %vm79_vm1, %v80_v11, %v78_v16  ;;  %v85_v18 = vsel %vm84_vm2, %v74_v9, %v83_v15 }
  0x3d   :  { %v88_v19 = vsel %vm86_vm3, %v87_v14, %v85_v18 }
  0x3e   :  { %v90_v20 = vadd.f32 %v88_v19, %v81_v17 }
  0x40   :  { %97 = vadd.xlane.f32.xlu0 %v90_v20 }
  0xcd   :  { %v98_v21 = vpop.xlane.xlu0 %97 }
  0xce   :  { %v99_v22 = vrot.slane %v98_v21, 4 }
  0xd0   :  { %v100_v23 = vadd.f32 %v99_v22, %v98_v21 }
  0xd2   :  { %v101_v24 = vrot.slane %v100_v23, 2 }
  0xd4   :  { %v102_v25 = vadd.f32 %v101_v24, %v100_v23 }
  0xd6   :  { %v103_v26 = vrot.slane %v102_v25, 1 }
  0xd8   :  { %v104_v27 = vadd.f32 %v103_v26, %v102_v25 }
  0xda   :  { %129 = vpush %v104_v27 }
 0x10b   :  { %s130_s7 = spop %129 }
 0x10c   :  { %v106_v28 = vstv %s130_s7 }
 0x10d   :  { %108 = vst.msk [vmem:[#allocation8] sm:$0x1] %vm107_vm4, %v106_v28 }
 0x10e   :  { %195 = shalt.err (!%p192_p6)
}
 0x10f   :  { %s196_s12 = scalar_lea.hbm %s270_s2, 16 }
 0x110   :  { %p197_p7 = scmp.ne.s32.totalorder %s270_s2, %s196_s12  ;;  %p200_p8 = scmp.lt.u32.totalorder %s196_s12, %s270_s2 }
 0x112   :  { %p202_p9 = pnand %p200_p8, %p197_p7 }
 0x114   :  { %205 = shalt.err (!%p202_p9)
}
 0x115   :  { %118 = dma.vmem_to_hbm [thread:$0]  %s116_s6, 16, %s270_s2, [#allocation5]  }
 0x116   :  { %210 = dma.done.wait [#allocation5], 16  }
 0x117   :  { %211 = vsyncadd [#allocation5], 4294967280 }
 0x118   :  { %122 = vsyncpa [#allocation4], 1 }
 0x119   :  { %123 = vsyncpa [#allocation7], 1 }
 0x11a   :  { %124 = vsyncpa [#allocation5], 1 }

</bundles_post_ra>
